<compile_context>
chip_gen: v5e
topology: v5e:2x2
jax: 0.10.0
libtpu: 0.0.40
codegen_flags: <defaults>
</compile_context>

<pallas_src>
import jax
import jax.numpy as jnp
from jax.experimental import pallas as pl
from jax.experimental.pallas import tpu as pltpu


def _identity_kernel(x_ref, o_ref):
    # Elementwise pass-through: load the whole VMEM tile and store it back.
    o_ref[...] = x_ref[...]


def filter_forward(x):
    """Pallas equivalent of Filter.forward(x) -> x (identity)."""
    orig_shape = x.shape
    n = x.size
    itemsize = x.dtype.itemsize

    # --- lane-dense 2D slab: last dim a multiple of 128 when possible -------
    cols = None
    for c in (512, 256, 128):
        if n % c == 0:
            cols = c
            break
    if cols is None:
        # Fallback: keep the original trailing dim as lanes.
        cols = orig_shape[-1]
    rows = n // cols
    x2d = x.reshape(rows, cols)  # layout glue (bitcast reshape, plain JAX)

    # --- row tiling: ~4 MiB per block, rows-per-block a multiple of 8 --------
    # 4 buffers (in + out, double-buffered) * 4 MiB = 16 MiB, within scoped
    # VMEM defaults on all generations.  Small inputs use one full-array block.
    target_block_bytes = 4 * 1024 * 1024
    rows_per_block = max(8, (target_block_bytes // (cols * itemsize)) // 8 * 8)
    if rows_per_block >= rows:
        rows_per_block = rows  # single block covering the full (small) array
    grid_rows = pl.cdiv(rows, rows_per_block)

    out2d = pl.pallas_call(
        _identity_kernel,
        out_shape=jax.ShapeDtypeStruct((rows, cols), x.dtype),
        grid=(grid_rows,),
        in_specs=[pl.BlockSpec((rows_per_block, cols), lambda i: (i, 0))],
        out_specs=pl.BlockSpec((rows_per_block, cols), lambda i: (i, 0)),
        input_output_aliases={0: 0},  # donate: identity needs no new HBM buffer
        compiler_params=pltpu.CompilerParams(
            dimension_semantics=("parallel",)),
        cost_estimate=pl.CostEstimate(
            flops=0, transcendentals=0, bytes_accessed=2 * n * itemsize),
    )(x2d)

    return out2d.reshape(orig_shape)


if __name__ == "__main__":
    key = jax.random.PRNGKey(0)
    # NCHW input, small shapes: batch=2, channels=4, spatial=16x16
    x = jax.random.normal(key, (2, 4, 16, 16), dtype=jnp.float32)

    # Filter(size) takes a `size` arg in __init__ but holds no parameters.
    y = filter_forward(x)
    jax.block_until_ready(y)

    assert y.shape == x.shape and y.dtype == x.dtype
    assert bool(jnp.all(y == x))
    print("KERNEL_OK")
</pallas_src>

<mosaic_0001>
module attributes {stable_mosaic.version = 11 : i64} {
  func.func @_identity_kernel(%arg0: i32, %arg1: memref<4x512xf32, #tpu.memory_space<vmem>>, %arg2: memref<4x512xf32, #tpu.memory_space<vmem>>) attributes {dimension_semantics = [#tpu.dimension_semantics<parallel>], iteration_bounds = array<i64: 1>, scalar_prefetch = 0 : i64, scratch_operands = 0 : i64, tpu.core_type = #tpu.core_type<tc>, window_params = [{transform_indices = @transform_0, window_bounds = array<i64: 4, 512>}, {transform_indices = @transform_1, window_bounds = array<i64: 4, 512>}]} {
    %c0 = arith.constant 0 : index
    %c0_0 = arith.constant 0 : index
    %0 = vector.load %arg1[%c0, %c0_0] : memref<4x512xf32, #tpu.memory_space<vmem>>, vector<4x512xf32>
    %c0_1 = arith.constant 0 : index
    %c0_2 = arith.constant 0 : index
    %1 = vector.load %arg2[%c0_1, %c0_2] : memref<4x512xf32, #tpu.memory_space<vmem>>, vector<4x512xf32>
    tpu.vector_store %arg2[%c0_1, %c0_2], %0 {strides = array<i32>} : memref<4x512xf32, #tpu.memory_space<vmem>>, vector<4x512xf32>,
    return
  }
  func.func @transform_0(%arg0: i32) -> (i32, i32) {
    %c0_i32 = arith.constant 0 : i32
    %c0_i32_0 = arith.constant 0 : i32
    return %arg0, %c0_i32 : i32, i32
  }
  func.func @transform_1(%arg0: i32) -> (i32, i32) {
    %c0_i32 = arith.constant 0 : i32
    %c0_i32_0 = arith.constant 0 : i32
    return %arg0, %c0_i32 : i32, i32
  }
}

</mosaic_0001>

<bundles_post_ra>
// kernel: tpu_custom_call.1
= control target key start
LH: loop header
LB: loop body
LE: loop exit
PB: predicated region body
PF: predicated region fallthrough
CT: control target
= control target key end

     0   :  { %6 = vsyncpa [#allocation3], 0  ;;  %s116_s0 = inlined_call_operand.hbm [shape: f32[4,512], index: 0, kind: input, shape index: {}, may-alias: {0,1}]   ;;  %s117_s1 = inlined_call_operand.hbm [shape: f32[4,512], index: 1, kind: output, shape index: {}, may-alias: {0,1}]  }
   0x1   :  { %7 = vsyncpa [#allocation4], 0  ;;  %s13_s8 = sshll.u32 %s116_s0, 4  ;;  %s98_s9 = smov [#allocation2]   ;;  %s14_s8 = int_to_ptr.hbm [resolvable:$true] %s13_s8 }
   0x2   :  { %s15_s10 = sshll.u32 %s98_s9, 4  ;;  %s16_s10 = int_to_ptr.vmem [resolvable:$true] %s15_s10 }
   0x3   :  { %18 = dma.hbm_to_vmem [thread:$0]  %s14_s8, 256, %s16_s10, [#allocation3]  }
   0x4   :  { %94 = dma.done.wait [#allocation3], 256  }
   0x5   :  { %95 = vsyncadd [#allocation3], 4294967040  ;;  %s99_s11 = smov [#allocation5]   ;;  %s34_s15 = sshll.u32 %s117_s1, 4  ;;  %v23_v0 = vld [vmem:[#allocation2] sm:$0xff]  ;;  %v24_v1 = vld [vmem:[#allocation2 + $0x8] sm:$0xff]  ;;  %s35_s15 = int_to_ptr.hbm [resolvable:$true] %s34_s15 }
   0x6   :  { %s32_s12 = sshll.u32 %s99_s11, 4  ;;  %25 = vst [vmem:[#allocation5] sm:$0xff] %v23_v0  ;;  %s33_s12 = int_to_ptr.vmem [resolvable:$true] %s32_s12 }
   0x7   :  { %26 = vst [vmem:[#allocation5 + $0x8] sm:$0xff] %v24_v1 }
   0x8   :  { %37 = dma.vmem_to_hbm [thread:$0]  %s33_s12, 256, %s35_s15, [#allocation4]  }
   0x9   :  { %96 = dma.done.wait [#allocation4], 256  }
   0xa   :  { %97 = vsyncadd [#allocation4], 4294967040 }
   0xb   :  { %42 = vsyncpa [#allocation3], 1 }
   0xc   :  { %43 = vsyncpa [#allocation4], 1 }

</bundles_post_ra>
